<compile_context>
chip_gen: v5e
topology: v5e:2x2
jax: 0.10.0
libtpu: 0.0.40
codegen_flags: <defaults>
</compile_context>

<pallas_src>
import functools

import jax
import jax.numpy as jnp
from jax import lax
from jax.experimental import pallas as pl
from jax.experimental.pallas import tpu as pltpu

_MIN_LANES = 128          # vreg lane width
_MASK_VALUE = -1.0e30     # finite "-inf": guards against exp(-inf - -inf) NaNs


def _pick_tile(T, dtype, pref=256):
    """Largest convenient seq tile: prefer `pref` (a 256-wide-MXU multiple),
    else a divisor of T that respects the packed-sublane minimum for dtype."""
    itemsize = jnp.dtype(dtype).itemsize
    min_rows = {4: 8, 2: 16, 1: 32}.get(itemsize, 8)
    if T >= pref and T % pref == 0:
        return pref
    for t in (128, 64, 32, 16, 8):
        if t >= min_rows and T % t == 0:
            return t
    return T


def _vmem_limit(footprint_bytes):
    """Explicit VMEM budget: headroom over the real block/scratch footprint,
    clamped so it is safe on v7x (64 MiB physical) as well as v5e/v6e."""
    return int(min(max(4 * footprint_bytes, 32 << 20), 48 << 20))


# ---------------------------------------------------------------------------
# Kernel 1: fused QKV projection (one matmul per x tile, computed once).
# ---------------------------------------------------------------------------
def _qkv_proj_kernel(x_ref, w_ref, q_ref, k_ref, v_ref, *, scale):
    d_out = q_ref.shape[-1]
    x = x_ref[...]                                             # (tt, d_in)
    qkv = jnp.dot(x, w_ref[...],
                  preferred_element_type=jnp.float32)          # (tt, 3*d_out)
    # Fold 1/sqrt(d_k) into Q once (cheaper than scaling the (T, T) scores).
    q_ref[...] = (qkv[:, :d_out] * scale).astype(q_ref.dtype)
    k_ref[...] = qkv[:, d_out:2 * d_out].astype(k_ref.dtype)
    v_ref[...] = qkv[:, 2 * d_out:].astype(v_ref.dtype)


# ---------------------------------------------------------------------------
# Kernel 2: flash-style causal attention over a flattened triangular grid.
# ---------------------------------------------------------------------------
def _flash_causal_kernel(qi_ref, kv_ref, q_ref, k_ref, v_ref, o_ref,
                         m_sc, l_sc, acc_sc):
    step = pl.program_id(1)
    qi = qi_ref[step]          # q-tile index for this step (SMEM scalar)
    kv = kv_ref[step]          # kv-tile index for this step (SMEM scalar)
    tq, d_out = q_ref.shape
    tk = k_ref.shape[0]

    @pl.when(kv == 0)
    def _init():
        m_sc[...] = jnp.full_like(m_sc, _MASK_VALUE)
        l_sc[...] = jnp.zeros_like(l_sc)
        acc_sc[...] = jnp.zeros_like(acc_sc)

    def scores():
        # q @ k^T without an explicit transpose (MXU consumes k directly).
        return lax.dot_general(q_ref[...], k_ref[...], (((1,), (1,)), ((), ())),
                               preferred_element_type=jnp.float32)   # (tq, tk)

    def online_update(s):
        m_prev = m_sc[...]                                     # (tq, 128) lane-uniform
        m_new = jnp.maximum(m_prev, jnp.max(s, axis=-1, keepdims=True))
        alpha = jnp.exp(m_prev - m_new)                        # (tq, 128)
        m_b = m_new if tk == _MIN_LANES else m_new[:, :1]
        p = jnp.exp(s - m_b)                                   # (tq, tk)
        l_sc[...] = alpha * l_sc[...] + jnp.sum(p, axis=-1, keepdims=True)
        acc_scale = alpha if d_out == _MIN_LANES else alpha[:, :1]
        acc_sc[...] = acc_scale * acc_sc[...] + jnp.dot(
            p.astype(v_ref.dtype), v_ref[...], preferred_element_type=jnp.float32)
        m_sc[...] = m_new

    # Off-diagonal kv tiles are fully visible — no mask construction at all.
    @pl.when(kv < qi)
    def _off_diag():
        online_update(scores())

    # Diagonal tile: the only place the causal mask bites.  With tq == tk it
    # is also the last contributing kv step for this q tile, so finalize here.
    @pl.when(kv == qi)
    def _diag_and_finalize():
        s = scores()
        row = lax.broadcasted_iota(jnp.int32, (tq, tk), 0)
        col = lax.broadcasted_iota(jnp.int32, (tq, tk), 1)
        s = jnp.where(col > row, _MASK_VALUE, s)
        online_update(s)
        l = l_sc[...] if d_out == _MIN_LANES else l_sc[:, :1]
        inv_l = pl.reciprocal(l, approx=False)   # exact: once per q tile, cheap
        o_ref[...] = (acc_sc[...] * inv_l).astype(o_ref.dtype)


# ---------------------------------------------------------------------------
# Wrapper
# ---------------------------------------------------------------------------
def causal_self_attention(x, w_query, w_key, w_value, *, tq=None, tk=None,
                          qkv_dtype=None):
    """x: (B, T, d_in); w_*: PyTorch-style (d_out, d_in) Linear weights (no bias).

    qkv_dtype=jnp.bfloat16 halves attention-input HBM traffic and runs QK^T /
    PV at bf16 MXU rate (deliberate precision trade-off); default keeps x.dtype.
    """
    B, T, d_in = x.shape
    d_out = w_query.shape[0]
    qkv_dtype = jnp.dtype(qkv_dtype) if qkv_dtype is not None else x.dtype
    scale = 1.0 / (float(d_out) ** 0.5)

    # Single fused projection weight (d_in, 3*d_out): one MXU weight push.
    w_qkv = jnp.concatenate([w_query.T, w_key.T, w_value.T], axis=1).astype(x.dtype)

    # ---- Kernel 1: fused QKV projection (tiled over batch and sequence) ----
    tt = _pick_tile(T, x.dtype)
    x_item = jnp.dtype(x.dtype).itemsize
    qkv_item = jnp.dtype(qkv_dtype).itemsize
    proj_fp = 2 * (tt * d_in * x_item + d_in * 3 * d_out * x_item
                   + 3 * tt * d_out * qkv_item)

    q, k, v = pl.pallas_call(
        functools.partial(_qkv_proj_kernel, scale=scale),
        out_shape=(jax.ShapeDtypeStruct((B, T, d_out), qkv_dtype),) * 3,
        grid_spec=pltpu.PrefetchScalarGridSpec(
            num_scalar_prefetch=0,
            grid=(B, T // tt),
            in_specs=[
                pl.BlockSpec((None, tt, d_in), lambda b, t: (b, t, 0)),
                # TODO(synk): the weight block index is constant; a single
                # buffer (pl.Buffered(1)) would drop its never-used 2nd copy.
                pl.BlockSpec((d_in, 3 * d_out), lambda b, t: (0, 0)),
            ],
            out_specs=[pl.BlockSpec((None, tt, d_out), lambda b, t: (b, t, 0))] * 3,
        ),
        compiler_params=pltpu.CompilerParams(
            dimension_semantics=("parallel", "parallel"),
            vmem_limit_bytes=_vmem_limit(proj_fp)),
    )(x, w_qkv)

    # ---- Kernel 2: flash causal attention, flattened triangular grid ----
    tq = tq or _pick_tile(T, qkv_dtype)
    tk = tk or tq
    assert tq == tk and T % tq == 0, "kernel assumes equal q/kv tiles dividing T"
    nq = T // tq

    # Lower-triangular (qi, kv) schedule: nq*(nq+1)/2 steps, no dead
    # above-diagonal iterations.  Scalar-prefetched so index_maps can look up
    # the per-step block indices.
    qi_list, kv_list = [], []
    for i in range(nq):
        for j in range(i + 1):
            qi_list.append(i)
            kv_list.append(j)
    qi_idx = jnp.asarray(qi_list, dtype=jnp.int32)
    kv_idx = jnp.asarray(kv_list, dtype=jnp.int32)
    n_steps = int(qi_idx.shape[0])

    blk = tq * d_out * qkv_item
    att_fp = 2 * 4 * blk + 2 * tq * _MIN_LANES * 4 + tq * d_out * 4

    q_map = lambda b, s, qi_a, kv_a: (b, qi_a[s], 0)
    kv_map = lambda b, s, qi_a, kv_a: (b, kv_a[s], 0)

    # TODO(synk): on v5e (low HBM BW) with small T*d_out, resident full-seq K/V
    # blocks would avoid the per-q-tile re-streaming; streaming kept here since
    # it is the right default for v6e/v7x VMEM budgets.
    out = pl.pallas_call(
        _flash_causal_kernel,
        out_shape=jax.ShapeDtypeStruct((B, T, d_out), x.dtype),
        grid_spec=pltpu.PrefetchScalarGridSpec(
            num_scalar_prefetch=2,
            grid=(B, n_steps),
            in_specs=[
                pl.BlockSpec((None, tq, d_out), q_map),
                pl.BlockSpec((None, tk, d_out), kv_map),
                pl.BlockSpec((None, tk, d_out), kv_map),
            ],
            out_specs=pl.BlockSpec((None, tq, d_out), q_map),
            scratch_shapes=[
                pltpu.VMEM((tq, _MIN_LANES), jnp.float32),  # running max m (lane-dense)
                pltpu.VMEM((tq, _MIN_LANES), jnp.float32),  # running denom l (lane-dense)
                pltpu.VMEM((tq, d_out), jnp.float32),       # output accumulator
            ],
        ),
        # NOTE: the flattened triangular axis must stay "arbitrary"; megacore
        # shards only B.  For B == 1 on v7x prefer the (B, nq, nk) grid so qi
        # can be sharded across the two TensorCores.
        compiler_params=pltpu.CompilerParams(
            dimension_semantics=("parallel", "arbitrary"),
            vmem_limit_bytes=_vmem_limit(att_fp)),
    )(qi_idx, kv_idx, q, k, v)

    # TODO(synk): nn.Dropout on attention weights is identity here (p=0 / eval
    # mode); PyTorch's RNG stream cannot be reproduced bit-exactly anyway.
    return out


def _reference(x, w_query, w_key, w_value):
    """Plain-JAX replica of the PyTorch forward (dropout = identity)."""
    q = x @ w_query.T
    k = x @ w_key.T
    v = x @ w_value.T
    s = jnp.einsum("btd,bsd->bts", q, k)
    T = x.shape[1]
    mask = jnp.triu(jnp.ones((T, T), dtype=bool), k=1)
    s = jnp.where(mask[None, :, :], -jnp.inf, s)
    w = jax.nn.softmax(s / jnp.sqrt(jnp.float32(k.shape[-1])), axis=-1)
    return w @ v


if __name__ == "__main__":
    # Small shapes consistent with the module's forward; d_out=128 keeps the
    # output lane-dense, tq=128 with T=256 exercises the multi-tile
    # (off-diagonal + diagonal) triangular-grid paths.
    B, T, d_in, d_out = 2, 256, 64, 128

    key = jax.random.PRNGKey(0)
    kx, kq, kk, kv_ = jax.random.split(key, 4)

    x = jax.random.normal(kx, (B, T, d_in), dtype=jnp.float32)
    # PyTorch Linear weight shape: (d_out, d_in).
    w_query = jax.random.normal(kq, (d_out, d_in), dtype=jnp.float32) * 0.05
    w_key = jax.random.normal(kk, (d_out, d_in), dtype=jnp.float32) * 0.05
    w_value = jax.random.normal(kv_, (d_out, d_in), dtype=jnp.float32) * 0.05

    out = causal_self_attention(x, w_query, w_key, w_value, tq=128, tk=128)
    out = jax.block_until_ready(out)

    ref = _reference(x, w_query, w_key, w_value)
    assert out.shape == (B, T, d_out)
    assert jnp.allclose(out, ref, atol=1e-2, rtol=1e-2), "mismatch vs reference"

    print("KERNEL_OK")
</pallas_src>

<mosaic_0001>
module attributes {stable_mosaic.version = 11 : i64} {
  func.func @_qkv_proj_kernel(%arg0: i32, %arg1: i32, %arg2: memref<1x256x64xf32, #tpu.memory_space<vmem>>, %arg3: memref<64x384xf32, #tpu.memory_space<vmem>>, %arg4: memref<1x256x128xf32, #tpu.memory_space<vmem>>, %arg5: memref<1x256x128xf32, #tpu.memory_space<vmem>>, %arg6: memref<1x256x128xf32, #tpu.memory_space<vmem>>) attributes {dimension_semantics = [#tpu.dimension_semantics<parallel>, #tpu.dimension_semantics<parallel>], iteration_bounds = array<i64: 2, 1>, scalar_prefetch = 0 : i64, scratch_operands = 0 : i64, tpu.core_type = #tpu.core_type<tc>, window_params = [{transform_indices = @transform_0, window_bounds = array<i64: 1, 256, 64>}, {pipeline_mode = #tpu.pipeline_mode<synchronous>, transform_indices = @transform_1, window_bounds = array<i64: 64, 384>}, {transform_indices = @transform_2, window_bounds = array<i64: 1, 256, 128>}, {transform_indices = @transform_3, window_bounds = array<i64: 1, 256, 128>}, {transform_indices = @transform_4, window_bounds = array<i64: 1, 256, 128>}]} {
    %c0 = arith.constant 0 : index
    %c0_0 = arith.constant 0 : index
    %c0_1 = arith.constant 0 : index
    %0 = vector.load %arg2[%c0, %c0_0, %c0_1] : memref<1x256x64xf32, #tpu.memory_space<vmem>>, vector<1x256x64xf32>
    %1 = vector.shape_cast %0 : vector<1x256x64xf32> to vector<256x64xf32>
    %c0_2 = arith.constant 0 : index
    %c0_3 = arith.constant 0 : index
    %2 = vector.load %arg3[%c0_2, %c0_3] : memref<64x384xf32, #tpu.memory_space<vmem>>, vector<64x384xf32>
    %cst = arith.constant dense<0.000000e+00> : vector<256x384xf32>
    %3 = tpu.matmul %1, %2, %cst {dimension_numbers = #tpu.dot_dimension_numbers<[1], [0], [0], [1], [0, 0, 1, 1], [], []>} : vector<256x64xf32>, vector<64x384xf32>, vector<256x384xf32> -> vector<256x384xf32>
    %4 = vector.extract_strided_slice %3 {offsets = [0, 0], sizes = [256, 128], strides = [1, 1]} : vector<256x384xf32> to vector<256x128xf32>
    %cst_4 = arith.constant 0.0883883461 : f32
    %5 = vector.broadcast %cst_4 : f32 to vector<256x128xf32>
    %6 = arith.mulf %4, %5 : vector<256x128xf32>
    %c0_5 = arith.constant 0 : index
    %c0_6 = arith.constant 0 : index
    %c0_7 = arith.constant 0 : index
    %7 = vector.load %arg4[%c0_5, %c0_6, %c0_7] : memref<1x256x128xf32, #tpu.memory_space<vmem>>, vector<1x256x128xf32>
    %8 = vector.shape_cast %7 : vector<1x256x128xf32> to vector<256x128xf32>
    %9 = vector.shape_cast %6 : vector<256x128xf32> to vector<1x256x128xf32>
    tpu.vector_store %arg4[%c0_5, %c0_6, %c0_7], %9 {strides = array<i32>} : memref<1x256x128xf32, #tpu.memory_space<vmem>>, vector<1x256x128xf32>,
    %10 = vector.extract_strided_slice %3 {offsets = [0, 128], sizes = [256, 128], strides = [1, 1]} : vector<256x384xf32> to vector<256x128xf32>
    %c0_8 = arith.constant 0 : index
    %c0_9 = arith.constant 0 : index
    %c0_10 = arith.constant 0 : index
    %11 = vector.load %arg5[%c0_8, %c0_9, %c0_10] : memref<1x256x128xf32, #tpu.memory_space<vmem>>, vector<1x256x128xf32>
    %12 = vector.shape_cast %11 : vector<1x256x128xf32> to vector<256x128xf32>
    %13 = vector.shape_cast %10 : vector<256x128xf32> to vector<1x256x128xf32>
    tpu.vector_store %arg5[%c0_8, %c0_9, %c0_10], %13 {strides = array<i32>} : memref<1x256x128xf32, #tpu.memory_space<vmem>>, vector<1x256x128xf32>,
    %14 = vector.extract_strided_slice %3 {offsets = [0, 256], sizes = [256, 128], strides = [1, 1]} : vector<256x384xf32> to vector<256x128xf32>
    %c0_11 = arith.constant 0 : index
    %c0_12 = arith.constant 0 : index
    %c0_13 = arith.constant 0 : index
    %15 = vector.load %arg6[%c0_11, %c0_12, %c0_13] : memref<1x256x128xf32, #tpu.memory_space<vmem>>, vector<1x256x128xf32>
    %16 = vector.shape_cast %15 : vector<1x256x128xf32> to vector<256x128xf32>
    %17 = vector.shape_cast %14 : vector<256x128xf32> to vector<1x256x128xf32>
    tpu.vector_store %arg6[%c0_11, %c0_12, %c0_13], %17 {strides = array<i32>} : memref<1x256x128xf32, #tpu.memory_space<vmem>>, vector<1x256x128xf32>,
    return
  }
  func.func @transform_0(%arg0: i32, %arg1: i32) -> (i32, i32, i32) {
    %c0_i32 = arith.constant 0 : i32
    %c0_i32_0 = arith.constant 0 : i32
    return %arg0, %arg1, %c0_i32 : i32, i32, i32
  }
  func.func @transform_1(%arg0: i32, %arg1: i32) -> (i32, i32) {
    %c0_i32 = arith.constant 0 : i32
    %c0_i32_0 = arith.constant 0 : i32
    %c0_i32_1 = arith.constant 0 : i32
    return %c0_i32, %c0_i32_0 : i32, i32
  }
  func.func @transform_2(%arg0: i32, %arg1: i32) -> (i32, i32, i32) {
    %c0_i32 = arith.constant 0 : i32
    %c0_i32_0 = arith.constant 0 : i32
    return %arg0, %arg1, %c0_i32 : i32, i32, i32
  }
  func.func @transform_3(%arg0: i32, %arg1: i32) -> (i32, i32, i32) {
    %c0_i32 = arith.constant 0 : i32
    %c0_i32_0 = arith.constant 0 : i32
    return %arg0, %arg1, %c0_i32 : i32, i32, i32
  }
  func.func @transform_4(%arg0: i32, %arg1: i32) -> (i32, i32, i32) {
    %c0_i32 = arith.constant 0 : i32
    %c0_i32_0 = arith.constant 0 : i32
    return %arg0, %arg1, %c0_i32 : i32, i32, i32
  }
}

</mosaic_0001>

<bundles_post_ra>
// kernel: tpu_custom_call.1
= control target key start
LH: loop header
LB: loop body
LE: loop exit
PB: predicated region body
PF: predicated region fallthrough
CT: control target
= control target key end

     0   :  { %s2012_s0 = inlined_call_operand.vmem [shape: f32[2,256,64], index: 0, kind: input, shape index: {}]   ;;  %s2013_s1 = inlined_call_operand.vmem [shape: f32[64,384], index: 1, kind: input, shape index: {}]   ;;  %s2014_s2 = inlined_call_operand.hbm [shape: f32[2,256,128], index: 2, kind: output, shape index: {0}]   ;;  %s2015_s3 = inlined_call_operand.hbm [shape: f32[2,256,128], index: 3, kind: output, shape index: {1}]   ;;  %s2016_s4 = inlined_call_operand.hbm [shape: f32[2,256,128], index: 4, kind: output, shape index: {2}]  }
   0x1   :  { %2020 = sst [smem:[#allocation10_spill]] %s2012_s0 }
   0x2   :  { %10 = vsyncpa [#allocation3], 0 }
   0x3   :  { %12 = vsyncpa [#allocation3 + $0x1], 0 }
   0x4   :  { %13 = vsyncpa [#allocation5], 0 }
   0x5   :  { %15 = vsyncpa [#allocation5 + $0x1], 0  ;;  %s1464_s15 = smov 0   ;;  %s1466_s16 = smov 0  }
   0x6   :  { %s1468_s17 = smov 0   ;;  %s1470_s18 = smov 0  }
   0x7   :  { %s1472_s19 = smov 0   ;;  %s1474_s20 = smov 0  }
   0x8 LB: > { %s1085_s21 = sadd.s32 4294967295, %s1435_s20   ;;  %s2017_s22 = sadd.s32 4294967294, %s1435_s20   ;;  %s1435_s20 = sphi %s1474_s20, %s21_s20   ;;  %s1431_s19 = sphi %s1472_s19, %s2033_s19   ;;  %s1427_s18 = sphi %s1470_s18, %s2032_s18   ;;  %s1423_s17 = sphi %s1468_s17, %s2031_s17   ;;  %s1419_s16 = sphi %s1466_s16, %s2030_s16   ;;  %s1415_s15 = sphi %s1464_s15, %s2029_s15  }
   0x9   : > { %s33_s23 = sadd.s32 1, %s1431_s19  ;;  %s91_s24 = sadd.s32 1, %s1423_s17 }
   0xa   : > { %p35_p0 = scmp.ge.s32.totalorder %s33_s23, 2  ;;  %p101_p1 = scmp.ne.s32.totalorder %s1423_s17, %s1419_s16 }
   0xb   : > { %p102_p2 = scmp.eq.s32.totalorder %s1085_s21, 1  ;;  %p107_p3 = scmp.ne.s32.totalorder %s1419_s16, %s1415_s15 }
   0xc   : > { %s2035_s23 = smov (%p35_p0, %s33_s23), 0  ;;  %p108_p5 = scmp.eq.s32.totalorder %s2017_s22, 1 }
   0xd   : > { %p1506_p4 = por %p102_p2, %p101_p1  ;;  %s86_s26 = ssub.s32 %s1431_s19, %s2035_s23 }
   0xe   : > { %p1089_p6 = scmp.ge.s32.totalorder %s1435_s20, 1  ;;  %p89_p7 = scmp.eq.s32.totalorder %s86_s26, 0 }
   0xf   : > { %p1515_p8 = por %p108_p5, %p107_p3  ;;  %p198_p9 = scmp.lt.s32.totalorder %s1435_s20, 3 }
  0x10   : > { %s1521_s28 = scalar_select %p89_p7, %s1423_s17, %s91_s24  }
  0x11   : > { %p199_p10 = pnand %p1089_p6, %p198_p9 }
  0x13   : > { %202 = sbr.rel (%p199_p10) target bundleno = 397 (0x18d), region = 28 }
  0x18   : > { %v304_v0 = vld [vmem:[%s2013_s1 + $0xa8] sm:$0xff]  ;;  %v1529_v1 = vld [vmem:[%s2013_s1 + $0xb8] sm:$0xff]  ;;  %v301_v2 = vld [vmem:[%s2013_s1 + $0x90] sm:$0xff]  ;;  %p239_p11 = scmp.lt.s32.totalorder %s1427_s18, 1  ;;  %s2023_s0 = sld [smem:[#allocation10_spill]]  ;;  %vm307_vm0 = vcmask 523264  }
  0x19   : > { %1206 = vmatpush.msra.mxu3 %v304_v0  ;;  %638 = vmatpush.msra.mxu2 %v1529_v1  ;;  %v1539_v3 = vld [vmem:[%s2013_s1 + $0xa0] sm:$0xff]  ;;  %v298_v4 = vld [vmem:[%s2013_s1 + $0x78] sm:$0xff]  ;;  %v1547_v5 = vld [vmem:[%s2013_s1 + $0x88] sm:$0xff]  ;;  %s221_s14 = sand.u32 1, %s1419_s16   ;;  %s1895_s8 = sand.u32 1, %s1085_s21  }
  0x1a   : > { %412 = vmatpush.msra.mxu0 %v304_v0  ;;  %v305_v6 = vld [vmem:[%s2013_s1 + $0xb0] sm:$0xff]  ;;  %v302_v7 = vld [vmem:[%s2013_s1 + $0x98] sm:$0xff]  ;;  %s240_s5 = scalar_select %p239_p11, %s1427_s18, 1  ;;  %v295_v8 = vld [vmem:[%s2013_s1 + $0x60] sm:$0xff] }
  0x1b   : > { %1207 = vmatpush.msra.mxu3 %v301_v2  ;;  %639 = vmatpush.msra.mxu2 %v1539_v3  ;;  %v1563_v9 = vld [vmem:[%s2013_s1 + $0x70] sm:$0xff]  ;;  %v299_v10 = vld [vmem:[%s2013_s1 + $0x80] sm:$0xff]  ;;  %v292_v11 = vld [vmem:[%s2013_s1 + $0x48] sm:$0xff]  ;;  %s1090_s24 = sshll.u32 %s221_s14, 8  ;;  %s1317_s13 = scalar_lea.hbm %s2015_s3, 512 }
  0x1c   : > { %525 = vmatpush.msra.mxu1 %v305_v6  ;;  %413 = vmatpush.msra.mxu0 %v301_v2  ;;  %v1575_v12 = vld [vmem:[%s2013_s1 + $0x58] sm:$0xff]  ;;  %v296_v13 = vld [vmem:[%s2013_s1 + $0x68] sm:$0xff]  ;;  %s1202_s30 = sshll.u32 %s240_s5, 8  ;;  %v289_v14 = vld [vmem:[%s2013_s1 + $0x30] sm:$0xff]  ;;  %s1753_s26 = scalar_lea.vmem [#allocation4], %s1090_s24 }
  0x1d   : > { %1208 = vmatpush.msra.mxu3 %v298_v4  ;;  %640 = vmatpush.msra.mxu2 %v1547_v5  ;;  %v1587_v15 = vld [vmem:[%s2013_s1 + $0x40] sm:$0xff]  ;;  %v293_v16 = vld [vmem:[%s2013_s1 + $0x50] sm:$0xff]  ;;  %v286_v17 = vld [vmem:[%s2013_s1 + $0x18] sm:$0xff]  ;;  %s1756_s6 = scalar_lea.vmem [#allocation2], %s1090_s24  ;;  %s1760_s7 = scalar_lea.vmem [#allocation6], %s1090_s24 }
  0x1e   : > { %526 = vmatpush.msra.mxu1 %v302_v7  ;;  %414 = vmatpush.msra.mxu0 %v298_v4  ;;  %v288_v18 = vld [vmem:[%s2013_s1 + $0x28] sm:$0xff]  ;;  %s1602_s29 = scalar_lea.vmem %s2023_s0, %s1202_s30  ;;  %v290_v19 = vld [vmem:[%s2013_s1 + $0x38] sm:$0xff]  ;;  %v283_v20 = vld [vmem:[%s2013_s1] sm:$0xff]  ;;  %s915_s30 = sshll.u32 %s1753_s26, 4  ;;  %s1910_s30 = int_to_ptr.vmem [resolvable:$true] %s915_s30 }
  0x1f   : > { %1209 = vmatpush.msra.mxu3 %v295_v8  ;;  %641 = vmatpush.msra.mxu2 %v1563_v9  ;;  %v285_v21 = vld [vmem:[%s2013_s1 + $0x10] sm:$0xff]  ;;  %v1615_v22 = vld [vmem:[%s1602_s29 + $0xc0] sm:$0xff]  ;;  %v284_v25 = vld [vmem:[%s2013_s1 + $0x8] sm:$0xff]  ;;  %s896_s9 = sshll.u32 %s1756_s6, 4  ;;  %s1924_s9 = int_to_ptr.vmem [resolvable:$true] %s896_s9 }
  0x20   : > { %527 = vmatpush.msra.mxu1 %v299_v10  ;;  %415 = vmatpush.msra.mxu0 %v295_v8  ;;  %v251_v23 = vld [vmem:[%s1602_s29] sm:$0xff]  ;;  %v1630_v26 = vld [vmem:[%s1602_s29 + $0xc8] sm:$0xff]  ;;  %v1639_v28 = vld [vmem:[%s1602_s29 + $0xd0] sm:$0xff] }
  0x21   : > { %1210 = vmatpush.msra.mxu3 %v292_v11  ;;  %642 = vmatpush.msra.mxu2 %v1575_v12  ;;  %v287_v24 = vld [vmem:[%s2013_s1 + $0x20] sm:$0xff]  ;;  %v252_v27 = vld [vmem:[%s1602_s29 + $0x8] sm:$0xff]  ;;  %v253_v29 = vld [vmem:[%s1602_s29 + $0x10] sm:$0xff] }
  0x22   : > { %528 = vmatpush.msra.mxu1 %v296_v13  ;;  %416 = vmatpush.msra.mxu0 %v292_v11  ;;  %v1650_v30 = vld [vmem:[%s1602_s29 + $0xd8] sm:$0xff]  ;;  %v1662_v32 = vld [vmem:[%s1602_s29 + $0xe0] sm:$0xff]  ;;  %v1672_v34 = vld [vmem:[%s1602_s29 + $0xe8] sm:$0xff] }
  0x23   : > { %1211 = vmatpush.msra.mxu3 %v289_v14  ;;  %643 = vmatpush.msra.mxu2 %v1587_v15  ;;  %v254_v31 = vld [vmem:[%s1602_s29 + $0x18] sm:$0xff]  ;;  %v255_v33 = vld [vmem:[%s1602_s29 + $0x20] sm:$0xff]  ;;  %v256_v35 = vld [vmem:[%s1602_s29 + $0x28] sm:$0xff] }
  0x24   : > { %529 = vmatpush.msra.mxu1 %v293_v16  ;;  %417 = vmatpush.msra.mxu0 %v289_v14  ;;  %v1681_v36 = vld [vmem:[%s1602_s29 + $0xf0] sm:$0xff]  ;;  %v1690_v38 = vld [vmem:[%s1602_s29 + $0xf8] sm:$0xff]  ;;  %v259_v40 = vld [vmem:[%s1602_s29 + $0x40] sm:$0xff] }
  0x25   : > { %1212 = vmatpush.msra.mxu3 %v286_v17  ;;  %644 = vmatpush.msra.mxu2 %v288_v18  ;;  %v257_v37 = vld [vmem:[%s1602_s29 + $0x30] sm:$0xff]  ;;  %v258_v39 = vld [vmem:[%s1602_s29 + $0x38] sm:$0xff]  ;;  %v260_v41 = vld [vmem:[%s1602_s29 + $0x48] sm:$0xff] }
  0x26   : > { %530 = vmatpush.msra.mxu1 %v290_v19  ;;  %418 = vmatpush.msra.mxu0 %v286_v17  ;;  %v261_v42 = vld [vmem:[%s1602_s29 + $0x50] sm:$0xff]  ;;  %v262_v43 = vld [vmem:[%s1602_s29 + $0x58] sm:$0xff]  ;;  %v263_v44 = vld [vmem:[%s1602_s29 + $0x60] sm:$0xff] }
  0x27   : > { %1213 = vmatpush.msra.mxu3 %v283_v20  ;;  %645 = vmatpush.msra.mxu2 %v285_v21  ;;  %v264_v45 = vld [vmem:[%s1602_s29 + $0x68] sm:$0xff]  ;;  %v265_v46 = vld [vmem:[%s1602_s29 + $0x70] sm:$0xff]  ;;  %v266_v47 = vld [vmem:[%s1602_s29 + $0x78] sm:$0xff] }
  0x28   : > { %1119 = vmatmul.msk.f32.vlgmr.msra.gmra.mxu3 %vm307_vm0, %v1615_v22  ;;  %1159 = vmatmul.msk.f32.vlgmr.msra.gmra.mxu2 %vm307_vm0, %v251_v23  ;;  %v267_v48 = vld [vmem:[%s1602_s29 + $0x80] sm:$0xff]  ;;  %v268_v55 = vld [vmem:[%s1602_s29 + $0x88] sm:$0xff]  ;;  %v269_v62 = vld [vmem:[%s1602_s29 + $0x90] sm:$0xff] }
  0x29   : > { %1214 = vmatpush.msrb.mxu3 %v305_v6  ;;  %531 = vmatpush.msra.mxu1 %v287_v24 }
  0x2a   : > { %419 = vmatpush.msra.mxu0 %v283_v20 }
  0x2b   : > { %1095 = vmatmul.msk.f32.vlgmr.msra.gmra.mxu0 %vm307_vm0, %v251_v23  ;;  %532 = vmatpush.msra.mxu1 %v284_v25 }
  0x2c   : > { %1127 = vmatmul.msk.f32.vlgmr.msra.gmra.mxu1 %vm307_vm0, %v251_v23  ;;  %1215 = vmatpush.msrb.mxu3 %v302_v7 }
  0x2e   : > { %1216 = vmatpush.msrb.mxu3 %v299_v10 }
  0x30   : > { %1120 = vmatmul.msk.f32.gmra.mxu3 %vm307_vm0, %v1630_v26  ;;  %1160 = vmatmul.msk.f32.gmra.mxu2 %vm307_vm0, %v252_v27 }
  0x31   : > { %1217 = vmatpush.msrb.mxu3 %v296_v13 }
  0x33   : > { %1096 = vmatmul.msk.f32.gmra.mxu0 %vm307_vm0, %v252_v27  ;;  %1218 = vmatpush.msrb.mxu3 %v293_v16 }
  0x34   : > { %1128 = vmatmul.msk.f32.gmra.mxu1 %vm307_vm0, %v252_v27 }
  0x35   : > { %1219 = vmatpush.msrb.mxu3 %v290_v19  ;;  %v272_v19 = vld [vmem:[%s1602_s29 + $0xa8] sm:$0xff] }
  0x37   : > { %1220 = vmatpush.msrb.mxu3 %v287_v24 }
  0x38   : > { %1121 = vmatmul.msk.f32.gmra.mxu3 %vm307_vm0, %v1639_v28  ;;  %1161 = vmatmul.msk.f32.gmra.mxu2 %vm307_vm0, %v253_v29 }
  0x39   : > { %1221 = vmatpush.msrb.mxu3 %v284_v25 }
  0x3b   : > { %1222 = vmatpush.msra.mxu3 %v1529_v1  ;;  %1097 = vmatmul.msk.f32.gmra.mxu0 %vm307_vm0, %v253_v29 }
  0x3c   : > { %1129 = vmatmul.msk.f32.gmra.mxu1 %vm307_vm0, %v253_v29 }
  0x3d   : > { %1223 = vmatpush.msra.mxu3 %v1539_v3 }
  0x3f   : > { %1224 = vmatpush.msra.mxu3 %v1547_v5  ;;  %v270_v5 = vld [vmem:[%s1602_s29 + $0x98] sm:$0xff] }
  0x40   : > { %1122 = vmatmul.msk.f32.gmra.mxu3 %vm307_vm0, %v1650_v30  ;;  %1162 = vmatmul.msk.f32.gmra.mxu2 %vm307_vm0, %v254_v31 }
  0x41   : > { %1225 = vmatpush.msra.mxu3 %v1563_v9 }
  0x43   : > { %1098 = vmatmul.msk.f32.gmra.mxu0 %vm307_vm0, %v254_v31  ;;  %1226 = vmatpush.msra.mxu3 %v1575_v12  ;;  %v271_v12 = vld [vmem:[%s1602_s29 + $0xa0] sm:$0xff] }
  0x44   : > { %1130 = vmatmul.msk.f32.gmra.mxu1 %vm307_vm0, %v254_v31 }
  0x45   : > { %1227 = vmatpush.msra.mxu3 %v1587_v15 }
  0x47   : > { %1228 = vmatpush.msra.mxu3 %v288_v18 }
  0x48   : > { %1123 = vmatmul.msk.f32.gmra.mxu3 %vm307_vm0, %v1662_v32  ;;  %1163 = vmatmul.msk.f32.gmra.mxu2 %vm307_vm0, %v255_v33 }
  0x49   : > { %1229 = vmatpush.msra.mxu3 %v285_v21 }
  0x4b   : > { %1099 = vmatmul.msk.f32.gmra.mxu0 %vm307_vm0, %v255_v33 }
  0x4c   : > { %1131 = vmatmul.msk.f32.gmra.mxu1 %vm307_vm0, %v255_v33  ;;  %v274_v33 = vld [vmem:[%s1602_s29 + $0xb8] sm:$0xff] }
  0x50   : > { %1124 = vmatmul.msk.f32.gmra.mxu3 %vm307_vm0, %v1672_v34  ;;  %1164 = vmatmul.msk.f32.gmra.mxu2 %vm307_vm0, %v256_v35 }
  0x53   : > { %1100 = vmatmul.msk.f32.gmra.mxu0 %vm307_vm0, %v256_v35 }
  0x54   : > { %1132 = vmatmul.msk.f32.gmra.mxu1 %vm307_vm0, %v256_v35 }
  0x58   : > { %1125 = vmatmul.msk.f32.gmra.mxu3 %vm307_vm0, %v1681_v36  ;;  %1165 = vmatmul.msk.f32.gmra.mxu2 %vm307_vm0, %v257_v37 }
  0x5b   : > { %1101 = vmatmul.msk.f32.gmra.mxu0 %vm307_vm0, %v257_v37 }
  0x5c   : > { %1133 = vmatmul.msk.f32.gmra.mxu1 %vm307_vm0, %v257_v37 }
  0x60   : > { %1126 = vmatmul.msk.f32.gmra.mxu3 %vm307_vm0, %v1690_v38  ;;  %1166 = vmatmul.msk.f32.gmra.mxu2 %vm307_vm0, %v258_v39 }
  0x63   : > { %1102 = vmatmul.msk.f32.gmra.mxu0 %vm307_vm0, %v258_v39 }
  0x64   : > { %1134 = vmatmul.msk.f32.gmra.mxu1 %vm307_vm0, %v258_v39 }
  0x68   : > { %1151 = vmatmul.msk.f32.vlgmr.msrb.gmra.mxu3 %vm307_vm0, %v1615_v22  ;;  %1167 = vmatmul.msk.f32.gmra.mxu2 %vm307_vm0, %v259_v40 }
  0x6b   : > { %1103 = vmatmul.msk.f32.gmra.mxu0 %vm307_vm0, %v259_v40 }
  0x6c   : > { %1135 = vmatmul.msk.f32.gmra.mxu1 %vm307_vm0, %v259_v40 }
  0x70   : > { %1152 = vmatmul.msk.f32.gmra.mxu3 %vm307_vm0, %v1630_v26  ;;  %1168 = vmatmul.msk.f32.gmra.mxu2 %vm307_vm0, %v260_v41 }
  0x73   : > { %1104 = vmatmul.msk.f32.gmra.mxu0 %vm307_vm0, %v260_v41 }
  0x74   : > { %1136 = vmatmul.msk.f32.gmra.mxu1 %vm307_vm0, %v260_v41 }
  0x78   : > { %1153 = vmatmul.msk.f32.gmra.mxu3 %vm307_vm0, %v1639_v28  ;;  %1169 = vmatmul.msk.f32.gmra.mxu2 %vm307_vm0, %v261_v42 }
  0x7b   : > { %1105 = vmatmul.msk.f32.gmra.mxu0 %vm307_vm0, %v261_v42 }
  0x7c   : > { %1137 = vmatmul.msk.f32.gmra.mxu1 %vm307_vm0, %v261_v42 }
  0x80   : > { %1154 = vmatmul.msk.f32.gmra.mxu3 %vm307_vm0, %v1650_v30  ;;  %1170 = vmatmul.msk.f32.gmra.mxu2 %vm307_vm0, %v262_v43 }
  0x83   : > { %1106 = vmatmul.msk.f32.gmra.mxu0 %vm307_vm0, %v262_v43 }
  0x84   : > { %1138 = vmatmul.msk.f32.gmra.mxu1 %vm307_vm0, %v262_v43 }
  0x88   : > { %1155 = vmatmul.msk.f32.gmra.mxu3 %vm307_vm0, %v1662_v32  ;;  %1171 = vmatmul.msk.f32.gmra.mxu2 %vm307_vm0, %v263_v44 }
  0x8b   : > { %1107 = vmatmul.msk.f32.gmra.mxu0 %vm307_vm0, %v263_v44 }
  0x8c   : > { %1139 = vmatmul.msk.f32.gmra.mxu1 %vm307_vm0, %v263_v44 }
  0x90   : > { %1156 = vmatmul.msk.f32.gmra.mxu3 %vm307_vm0, %v1672_v34  ;;  %1172 = vmatmul.msk.f32.gmra.mxu2 %vm307_vm0, %v264_v45 }
  0x93   : > { %1108 = vmatmul.msk.f32.gmra.mxu0 %vm307_vm0, %v264_v45 }
  0x94   : > { %1140 = vmatmul.msk.f32.gmra.mxu1 %vm307_vm0, %v264_v45 }
  0x98   : > { %1157 = vmatmul.msk.f32.gmra.mxu3 %vm307_vm0, %v1681_v36  ;;  %1173 = vmatmul.msk.f32.gmra.mxu2 %vm307_vm0, %v265_v46 }
  0x9b   : > { %1109 = vmatmul.msk.f32.gmra.mxu0 %vm307_vm0, %v265_v46 }
  0x9c   : > { %1141 = vmatmul.msk.f32.gmra.mxu1 %vm307_vm0, %v265_v46 }
  0xa0   : > { %1158 = vmatmul.msk.f32.gmra.mxu3 %vm307_vm0, %v1690_v38  ;;  %1174 = vmatmul.msk.f32.gmra.mxu2 %vm307_vm0, %v266_v47 }
  0xa3   : > { %1110 = vmatmul.msk.f32.gmra.mxu0 %vm307_vm0, %v266_v47 }
  0xa4   : > { %1142 = vmatmul.msk.f32.gmra.mxu1 %vm307_vm0, %v266_v47 }
  0xa8   : > { %1175 = vmatmul.msk.f32.gmra.mxu2 %vm307_vm0, %v267_v48  ;;  %1183 = vmatmul.msk.f32.vlgmr.msra.gmra.mxu3 %vm307_vm0, %v1615_v22  ;;  %v421_v49 = vpop.f32.mrf.mxu0 }
  0xa9   : > { %v743_v50 = vmul.f32 0.088388346, %v421_v49  ;;  %v534_v51 = vpop.f32.mrf.mxu1 }
  0xaa   : > { %807 = vst [vmem:[%s1753_s26] sm:$0xff] %v534_v51 }
  0xab   : > { %775 = vst [vmem:[%s1756_s6] sm:$0xff] %v743_v50  ;;  %v493_v52 = vpop.f32.mrf.mxu3  ;;  %v647_v53 = vpop.f32.mrf.mxu2  ;;  %1111 = vmatmul.msk.f32.gmra.mxu0 %vm307_vm0, %v267_v48 }
  0xac   : > { %v767_v54 = vmul.f32 0.088388346, %v493_v52  ;;  %839 = vst [vmem:[%s1760_s7] sm:$0xff] %v647_v53  ;;  %1143 = vmatmul.msk.f32.gmra.mxu1 %vm307_vm0, %v267_v48 }
  0xae   : > { %799 = vst [vmem:[%s1756_s6 + $0xc0] sm:$0xff] %v767_v54 }
  0xb0   : > { %1176 = vmatmul.msk.f32.gmra.mxu2 %vm307_vm0, %v268_v55  ;;  %1184 = vmatmul.msk.f32.gmra.mxu3 %vm307_vm0, %v1630_v26  ;;  %v424_v56 = vpop.f32.mrf.mxu0  ;;  %v273_v26 = vld [vmem:[%s1602_s29 + $0xb0] sm:$0xff]  ;;  %s1203_s29 = sshll.u32 %s1427_s18, 8  ;;  %s934_s18 = sshll.u32 %s1760_s7, 4  ;;  %s1929_s18 = int_to_ptr.vmem [resolvable:$true] %s934_s18 }
  0xb1   : > { %v744_v57 = vmul.f32 0.088388346, %v424_v56  ;;  %v537_v58 = vpop.f32.mrf.mxu1  ;;  %s914_s11 = scalar_lea.hbm %s2015_s3, %s1203_s29  ;;  %s895_s12 = scalar_lea.hbm %s2014_s2, %s1203_s29 }
  0xb2   : > { %808 = vst [vmem:[%s1753_s26 + $0x8] sm:$0xff] %v537_v58  ;;  %s933_s24 = scalar_lea.hbm %s2016_s4, %s1203_s29  ;;  %s1912_s22 = sshll.u32 %s914_s11, 4  ;;  %s918_s22 = int_to_ptr.hbm [resolvable:$true] %s1912_s22 }
  0xb3   : > { %776 = vst [vmem:[%s1756_s6 + $0x8] sm:$0xff] %v744_v57  ;;  %v496_v59 = vpop.f32.mrf.mxu3  ;;  %v650_v60 = vpop.f32.mrf.mxu2  ;;  %1112 = vmatmul.msk.f32.gmra.mxu0 %vm307_vm0, %v268_v55  ;;  %s1915_s10 = sshll.u32 %s895_s12, 4  ;;  %s1918_s5 = sshll.u32 %s933_s24, 4  ;;  %s899_s10 = int_to_ptr.hbm [resolvable:$true] %s1915_s10 }
  0xb4   : > { %v768_v61 = vmul.f32 0.088388346, %v496_v59  ;;  %840 = vst [vmem:[%s1760_s7 + $0x8] sm:$0xff] %v650_v60  ;;  %1144 = vmatmul.msk.f32.gmra.mxu1 %vm307_vm0, %v268_v55  ;;  %2024 = sst [smem:[#allocation9_spill]] %s1918_s5  ;;  %s877_s29 = scalar_lea.sflag [#allocation5], %s1895_s8 }
  0xb5   : > { %s1311_s11 = sshra.s32 %s918_s22, 4  ;;  %s1312_s11 = int_to_ptr.hbm [resolvable:$true] %s1311_s11 }
  0xb6   : > { %800 = vst [vmem:[%s1756_s6 + $0xc8] sm:$0xff] %v768_v61  ;;  %p1318_p1 = scmp.lt.s32.totalorder %s1312_s11, %s2015_s3 }
  0xb8   : > { %1177 = vmatmul.msk.f32.gmra.mxu2 %vm307_vm0, %v269_v62  ;;  %1185 = vmatmul.msk.f32.gmra.mxu3 %vm307_vm0, %v1639_v28  ;;  %v427_v63 = vpop.f32.mrf.mxu0 }
  0xb9   : > { %v745_v0 = vmul.f32 0.088388346, %v427_v63  ;;  %v540_v1 = vpop.f32.mrf.mxu1 }
  0xba   : > { %809 = vst [vmem:[%s1753_s26 + $0x10] sm:$0xff] %v540_v1 }
  0xbb   : > { %777 = vst [vmem:[%s1756_s6 + $0x10] sm:$0xff] %v745_v0  ;;  %v499_v2 = vpop.f32.mrf.mxu3  ;;  %v653_v3 = vpop.f32.mrf.mxu2  ;;  %1113 = vmatmul.msk.f32.gmra.mxu0 %vm307_vm0, %v269_v62 }
  0xbc   : > { %v769_v4 = vmul.f32 0.088388346, %v499_v2  ;;  %841 = vst [vmem:[%s1760_s7 + $0x10] sm:$0xff] %v653_v3  ;;  %1145 = vmatmul.msk.f32.gmra.mxu1 %vm307_vm0, %v269_v62 }
  0xbe   : > { %801 = vst [vmem:[%s1756_s6 + $0xd0] sm:$0xff] %v769_v4 }
  0xc0   : > { %1178 = vmatmul.msk.f32.gmra.mxu2 %vm307_vm0, %v270_v5  ;;  %1186 = vmatmul.msk.f32.gmra.mxu3 %vm307_vm0, %v1650_v30  ;;  %v430_v6 = vpop.f32.mrf.mxu0 }
  0xc1   : > { %v746_v7 = vmul.f32 0.088388346, %v430_v6  ;;  %v543_v8 = vpop.f32.mrf.mxu1 }
  0xc2   : > { %810 = vst [vmem:[%s1753_s26 + $0x18] sm:$0xff] %v543_v8 }
  0xc3   : > { %778 = vst [vmem:[%s1756_s6 + $0x18] sm:$0xff] %v746_v7  ;;  %v502_v9 = vpop.f32.mrf.mxu3  ;;  %v656_v10 = vpop.f32.mrf.mxu2  ;;  %1114 = vmatmul.msk.f32.gmra.mxu0 %vm307_vm0, %v270_v5 }
  0xc4   : > { %v770_v11 = vmul.f32 0.088388346, %v502_v9  ;;  %842 = vst [vmem:[%s1760_s7 + $0x18] sm:$0xff] %v656_v10  ;;  %1146 = vmatmul.msk.f32.gmra.mxu1 %vm307_vm0, %v270_v5 }
  0xc6   : > { %802 = vst [vmem:[%s1756_s6 + $0xd8] sm:$0xff] %v770_v11 }
  0xc8   : > { %1179 = vmatmul.msk.f32.gmra.mxu2 %vm307_vm0, %v271_v12  ;;  %1187 = vmatmul.msk.f32.gmra.mxu3 %vm307_vm0, %v1662_v32  ;;  %v433_v13 = vpop.f32.mrf.mxu0 }
  0xc9   : > { %v747_v14 = vmul.f32 0.088388346, %v433_v13  ;;  %v546_v15 = vpop.f32.mrf.mxu1 }
  0xca   : > { %811 = vst [vmem:[%s1753_s26 + $0x20] sm:$0xff] %v546_v15 }
  0xcb   : > { %779 = vst [vmem:[%s1756_s6 + $0x20] sm:$0xff] %v747_v14  ;;  %v505_v16 = vpop.f32.mrf.mxu3  ;;  %v659_v17 = vpop.f32.mrf.mxu2  ;;  %1115 = vmatmul.msk.f32.gmra.mxu0 %vm307_vm0, %v271_v12 }
  0xcc   : > { %v771_v18 = vmul.f32 0.088388346, %v505_v16  ;;  %843 = vst [vmem:[%s1760_s7 + $0x20] sm:$0xff] %v659_v17  ;;  %1147 = vmatmul.msk.f32.gmra.mxu1 %vm307_vm0, %v271_v12 }
  0xce   : > { %803 = vst [vmem:[%s1756_s6 + $0xe0] sm:$0xff] %v771_v18 }
  0xd0   : > { %1180 = vmatmul.msk.f32.gmra.mxu2 %vm307_vm0, %v272_v19  ;;  %1188 = vmatmul.msk.f32.gmra.mxu3 %vm307_vm0, %v1672_v34  ;;  %v436_v20 = vpop.f32.mrf.mxu0 }
  0xd1   : > { %v748_v21 = vmul.f32 0.088388346, %v436_v20  ;;  %v549_v22 = vpop.f32.mrf.mxu1 }
  0xd2   : > { %812 = vst [vmem:[%s1753_s26 + $0x28] sm:$0xff] %v549_v22 }
  0xd3   : > { %780 = vst [vmem:[%s1756_s6 + $0x28] sm:$0xff] %v748_v21  ;;  %v508_v23 = vpop.f32.mrf.mxu3  ;;  %v662_v24 = vpop.f32.mrf.mxu2  ;;  %1116 = vmatmul.msk.f32.gmra.mxu0 %vm307_vm0, %v272_v19 }
  0xd4   : > { %v772_v25 = vmul.f32 0.088388346, %v508_v23  ;;  %844 = vst [vmem:[%s1760_s7 + $0x28] sm:$0xff] %v662_v24  ;;  %1148 = vmatmul.msk.f32.gmra.mxu1 %vm307_vm0, %v272_v19 }
  0xd6   : > { %804 = vst [vmem:[%s1756_s6 + $0xe8] sm:$0xff] %v772_v25 }
  0xd8   : > { %1181 = vmatmul.msk.f32.gmra.mxu2 %vm307_vm0, %v273_v26  ;;  %1189 = vmatmul.msk.f32.gmra.mxu3 %vm307_vm0, %v1681_v36  ;;  %v439_v27 = vpop.f32.mrf.mxu0 }
  0xd9   : > { %v749_v28 = vmul.f32 0.088388346, %v439_v27  ;;  %v552_v29 = vpop.f32.mrf.mxu1 }
  0xda   : > { %813 = vst [vmem:[%s1753_s26 + $0x30] sm:$0xff] %v552_v29 }
  0xdb   : > { %781 = vst [vmem:[%s1756_s6 + $0x30] sm:$0xff] %v749_v28  ;;  %v511_v30 = vpop.f32.mrf.mxu3  ;;  %v665_v31 = vpop.f32.mrf.mxu2  ;;  %1117 = vmatmul.msk.f32.gmra.mxu0 %vm307_vm0, %v273_v26 }
  0xdc   : > { %v773_v32 = vmul.f32 0.088388346, %v511_v30  ;;  %845 = vst [vmem:[%s1760_s7 + $0x30] sm:$0xff] %v665_v31  ;;  %1149 = vmatmul.msk.f32.gmra.mxu1 %vm307_vm0, %v273_v26 }
  0xde   : > { %805 = vst [vmem:[%s1756_s6 + $0xf0] sm:$0xff] %v773_v32 }
  0xe0   : > { %1182 = vmatmul.msk.f32.gmra.mxu2 %vm307_vm0, %v274_v33  ;;  %1190 = vmatmul.msk.f32.gmra.mxu3 %vm307_vm0, %v1690_v38  ;;  %v442_v34 = vpop.f32.mrf.mxu0 }
  0xe1   : > { %v750_v35 = vmul.f32 0.088388346, %v442_v34  ;;  %v555_v36 = vpop.f32.mrf.mxu1 }
  0xe2   : > { %814 = vst [vmem:[%s1753_s26 + $0x38] sm:$0xff] %v555_v36 }
  0xe3   : > { %782 = vst [vmem:[%s1756_s6 + $0x38] sm:$0xff] %v750_v35  ;;  %v514_v37 = vpop.f32.mrf.mxu3  ;;  %v668_v39 = vpop.f32.mrf.mxu2  ;;  %1118 = vmatmul.msk.f32.gmra.mxu0 %vm307_vm0, %v274_v33 }
  0xe4   : > { %v774_v40 = vmul.f32 0.088388346, %v514_v37  ;;  %846 = vst [vmem:[%s1760_s7 + $0x38] sm:$0xff] %v668_v39  ;;  %1150 = vmatmul.msk.f32.gmra.mxu1 %vm307_vm0, %v274_v33 }
  0xe6   : > { %806 = vst [vmem:[%s1756_s6 + $0xf8] sm:$0xff] %v774_v40 }
  0xe8   : > { %v445_v38 = vpop.f32.mrf.mxu0 }
  0xe9   : > { %v751_v41 = vmul.f32 0.088388346, %v445_v38  ;;  %v558_v42 = vpop.f32.mrf.mxu1 }
  0xea   : > { %815 = vst [vmem:[%s1753_s26 + $0x40] sm:$0xff] %v558_v42 }
  0xeb   : > { %783 = vst [vmem:[%s1756_s6 + $0x40] sm:$0xff] %v751_v41  ;;  %v606_v43 = vpop.f32.mrf.mxu3  ;;  %v671_v44 = vpop.f32.mrf.mxu2 }
  0xec   : > { %831 = vst [vmem:[%s1753_s26 + $0xc0] sm:$0xff] %v606_v43 }
  0xed   : > { %847 = vst [vmem:[%s1760_s7 + $0x40] sm:$0xff] %v671_v44 }
  0xf0   : > { %v448_v45 = vpop.f32.mrf.mxu0 }
  0xf1   : > { %v752_v46 = vmul.f32 0.088388346, %v448_v45  ;;  %v561_v47 = vpop.f32.mrf.mxu1 }
  0xf2   : > { %816 = vst [vmem:[%s1753_s26 + $0x48] sm:$0xff] %v561_v47 }
  0xf3   : > { %784 = vst [vmem:[%s1756_s6 + $0x48] sm:$0xff] %v752_v46  ;;  %v609_v48 = vpop.f32.mrf.mxu3  ;;  %v674_v49 = vpop.f32.mrf.mxu2 }
  0xf4   : > { %832 = vst [vmem:[%s1753_s26 + $0xc8] sm:$0xff] %v609_v48 }
  0xf5   : > { %848 = vst [vmem:[%s1760_s7 + $0x48] sm:$0xff] %v674_v49 }
  0xf8   : > { %v451_v50 = vpop.f32.mrf.mxu0 }
  0xf9   : > { %v753_v51 = vmul.f32 0.088388346, %v451_v50  ;;  %v564_v52 = vpop.f32.mrf.mxu1 }
  0xfa   : > { %817 = vst [vmem:[%s1753_s26 + $0x50] sm:$0xff] %v564_v52 }
  0xfb   : > { %785 = vst [vmem:[%s1756_s6 + $0x50] sm:$0xff] %v753_v51  ;;  %v612_v53 = vpop.f32.mrf.mxu3  ;;  %v677_v54 = vpop.f32.mrf.mxu2 }
  0xfc   : > { %833 = vst [vmem:[%s1753_s26 + $0xd0] sm:$0xff] %v612_v53 }
  0xfd   : > { %849 = vst [vmem:[%s1760_s7 + $0x50] sm:$0xff] %v677_v54 }
 0x100   : > { %v454_v55 = vpop.f32.mrf.mxu0 }
 0x101   : > { %v754_v56 = vmul.f32 0.088388346, %v454_v55  ;;  %v567_v57 = vpop.f32.mrf.mxu1 }
 0x102   : > { %818 = vst [vmem:[%s1753_s26 + $0x58] sm:$0xff] %v567_v57 }
 0x103   : > { %786 = vst [vmem:[%s1756_s6 + $0x58] sm:$0xff] %v754_v56  ;;  %v615_v58 = vpop.f32.mrf.mxu3  ;;  %v680_v59 = vpop.f32.mrf.mxu2 }
 0x104   : > { %834 = vst [vmem:[%s1753_s26 + $0xd8] sm:$0xff] %v615_v58 }
 0x105   : > { %850 = vst [vmem:[%s1760_s7 + $0x58] sm:$0xff] %v680_v59 }
 0x108   : > { %v457_v60 = vpop.f32.mrf.mxu0 }
 0x109   : > { %v755_v61 = vmul.f32 0.088388346, %v457_v60  ;;  %v570_v62 = vpop.f32.mrf.mxu1 }
 0x10a   : > { %819 = vst [vmem:[%s1753_s26 + $0x60] sm:$0xff] %v570_v62 }
 0x10b   : > { %787 = vst [vmem:[%s1756_s6 + $0x60] sm:$0xff] %v755_v61  ;;  %v618_v63 = vpop.f32.mrf.mxu3  ;;  %v683_v0 = vpop.f32.mrf.mxu2 }
 0x10c   : > { %835 = vst [vmem:[%s1753_s26 + $0xe0] sm:$0xff] %v618_v63 }
 0x10d   : > { %851 = vst [vmem:[%s1760_s7 + $0x60] sm:$0xff] %v683_v0 }
 0x110   : > { %v460_v1 = vpop.f32.mrf.mxu0 }
 0x111   : > { %v756_v2 = vmul.f32 0.088388346, %v460_v1  ;;  %v573_v3 = vpop.f32.mrf.mxu1 }
 0x112   : > { %820 = vst [vmem:[%s1753_s26 + $0x68] sm:$0xff] %v573_v3 }
 0x113   : > { %788 = vst [vmem:[%s1756_s6 + $0x68] sm:$0xff] %v756_v2  ;;  %v621_v4 = vpop.f32.mrf.mxu3  ;;  %v686_v5 = vpop.f32.mrf.mxu2 }
 0x114   : > { %836 = vst [vmem:[%s1753_s26 + $0xe8] sm:$0xff] %v621_v4 }
 0x115   : > { %852 = vst [vmem:[%s1760_s7 + $0x68] sm:$0xff] %v686_v5 }
 0x118   : > { %v463_v6 = vpop.f32.mrf.mxu0 }
 0x119   : > { %v757_v7 = vmul.f32 0.088388346, %v463_v6  ;;  %v576_v8 = vpop.f32.mrf.mxu1 }
 0x11a   : > { %821 = vst [vmem:[%s1753_s26 + $0x70] sm:$0xff] %v576_v8 }
 0x11b   : > { %789 = vst [vmem:[%s1756_s6 + $0x70] sm:$0xff] %v757_v7  ;;  %v624_v9 = vpop.f32.mrf.mxu3  ;;  %v689_v10 = vpop.f32.mrf.mxu2 }
 0x11c   : > { %837 = vst [vmem:[%s1753_s26 + $0xf0] sm:$0xff] %v624_v9 }
 0x11d   : > { %853 = vst [vmem:[%s1760_s7 + $0x70] sm:$0xff] %v689_v10 }
 0x120   : > { %v466_v11 = vpop.f32.mrf.mxu0 }
 0x121   : > { %v758_v12 = vmul.f32 0.088388346, %v466_v11  ;;  %v579_v13 = vpop.f32.mrf.mxu1 }
 0x122   : > { %822 = vst [vmem:[%s1753_s26 + $0x78] sm:$0xff] %v579_v13 }
 0x123   : > { %790 = vst [vmem:[%s1756_s6 + $0x78] sm:$0xff] %v758_v12  ;;  %v627_v14 = vpop.f32.mrf.mxu3  ;;  %v692_v15 = vpop.f32.mrf.mxu2 }
 0x124   : > { %838 = vst [vmem:[%s1753_s26 + $0xf8] sm:$0xff] %v627_v14 }
 0x125   : > { %854 = vst [vmem:[%s1760_s7 + $0x78] sm:$0xff] %v692_v15 }
 0x128   : > { %v469_v16 = vpop.f32.mrf.mxu0 }
 0x129   : > { %v759_v17 = vmul.f32 0.088388346, %v469_v16  ;;  %v582_v18 = vpop.f32.mrf.mxu1 }
 0x12a   : > { %823 = vst [vmem:[%s1753_s26 + $0x80] sm:$0xff] %v582_v18 }
 0x12b   : > { %791 = vst [vmem:[%s1756_s6 + $0x80] sm:$0xff] %v759_v17  ;;  %v695_v19 = vpop.f32.mrf.mxu2  ;;  %v719_v20 = vpop.f32.mrf.mxu3 }
 0x12c   : > { %855 = vst [vmem:[%s1760_s7 + $0x80] sm:$0xff] %v695_v19 }
 0x12d   : > { %863 = vst [vmem:[%s1760_s7 + $0xc0] sm:$0xff] %v719_v20 }
 0x130   : > { %v472_v21 = vpop.f32.mrf.mxu0 }
 0x131   : > { %v760_v22 = vmul.f32 0.088388346, %v472_v21  ;;  %v585_v23 = vpop.f32.mrf.mxu1 }
 0x132   : > { %824 = vst [vmem:[%s1753_s26 + $0x88] sm:$0xff] %v585_v23 }
 0x133   : > { %792 = vst [vmem:[%s1756_s6 + $0x88] sm:$0xff] %v760_v22  ;;  %v698_v24 = vpop.f32.mrf.mxu2  ;;  %v722_v25 = vpop.f32.mrf.mxu3 }
 0x134   : > { %856 = vst [vmem:[%s1760_s7 + $0x88] sm:$0xff] %v698_v24 }
 0x135   : > { %864 = vst [vmem:[%s1760_s7 + $0xc8] sm:$0xff] %v722_v25 }
 0x138   : > { %v475_v26 = vpop.f32.mrf.mxu0 }
 0x139   : > { %v761_v27 = vmul.f32 0.088388346, %v475_v26  ;;  %v588_v28 = vpop.f32.mrf.mxu1 }
 0x13a   : > { %825 = vst [vmem:[%s1753_s26 + $0x90] sm:$0xff] %v588_v28 }
 0x13b   : > { %793 = vst [vmem:[%s1756_s6 + $0x90] sm:$0xff] %v761_v27  ;;  %v701_v29 = vpop.f32.mrf.mxu2  ;;  %v725_v30 = vpop.f32.mrf.mxu3 }
 0x13c   : > { %857 = vst [vmem:[%s1760_s7 + $0x90] sm:$0xff] %v701_v29 }
 0x13d   : > { %865 = vst [vmem:[%s1760_s7 + $0xd0] sm:$0xff] %v725_v30 }
 0x140   : > { %v478_v31 = vpop.f32.mrf.mxu0 }
 0x141   : > { %v762_v32 = vmul.f32 0.088388346, %v478_v31  ;;  %v591_v33 = vpop.f32.mrf.mxu1 }
 0x142   : > { %826 = vst [vmem:[%s1753_s26 + $0x98] sm:$0xff] %v591_v33 }
 0x143   : > { %794 = vst [vmem:[%s1756_s6 + $0x98] sm:$0xff] %v762_v32  ;;  %v704_v34 = vpop.f32.mrf.mxu2  ;;  %v728_v35 = vpop.f32.mrf.mxu3 }
 0x144   : > { %858 = vst [vmem:[%s1760_s7 + $0x98] sm:$0xff] %v704_v34 }
 0x145   : > { %866 = vst [vmem:[%s1760_s7 + $0xd8] sm:$0xff] %v728_v35 }
 0x148   : > { %v481_v36 = vpop.f32.mrf.mxu0 }
 0x149   : > { %v763_v37 = vmul.f32 0.088388346, %v481_v36  ;;  %v594_v39 = vpop.f32.mrf.mxu1 }
 0x14a   : > { %827 = vst [vmem:[%s1753_s26 + $0xa0] sm:$0xff] %v594_v39 }
 0x14b   : > { %795 = vst [vmem:[%s1756_s6 + $0xa0] sm:$0xff] %v763_v37  ;;  %v707_v40 = vpop.f32.mrf.mxu2  ;;  %v731_v38 = vpop.f32.mrf.mxu3 }
 0x14c   : > { %859 = vst [vmem:[%s1760_s7 + $0xa0] sm:$0xff] %v707_v40 }
 0x14d   : > { %867 = vst [vmem:[%s1760_s7 + $0xe0] sm:$0xff] %v731_v38 }
 0x150   : > { %v484_v41 = vpop.f32.mrf.mxu0 }
 0x151   : > { %v764_v42 = vmul.f32 0.088388346, %v484_v41  ;;  %v597_v43 = vpop.f32.mrf.mxu1 }
 0x152   : > { %828 = vst [vmem:[%s1753_s26 + $0xa8] sm:$0xff] %v597_v43 }
 0x153   : > { %796 = vst [vmem:[%s1756_s6 + $0xa8] sm:$0xff] %v764_v42  ;;  %v710_v44 = vpop.f32.mrf.mxu2  ;;  %v734_v45 = vpop.f32.mrf.mxu3 }
 0x154   : > { %860 = vst [vmem:[%s1760_s7 + $0xa8] sm:$0xff] %v710_v44 }
 0x155   : > { %868 = vst [vmem:[%s1760_s7 + $0xe8] sm:$0xff] %v734_v45 }
 0x158   : > { %v487_v46 = vpop.f32.mrf.mxu0 }
 0x159   : > { %v765_v47 = vmul.f32 0.088388346, %v487_v46  ;;  %v600_v48 = vpop.f32.mrf.mxu1 }
 0x15a   : > { %829 = vst [vmem:[%s1753_s26 + $0xb0] sm:$0xff] %v600_v48 }
 0x15b   : > { %797 = vst [vmem:[%s1756_s6 + $0xb0] sm:$0xff] %v765_v47  ;;  %v713_v49 = vpop.f32.mrf.mxu2  ;;  %v737_v50 = vpop.f32.mrf.mxu3 }
 0x15c   : > { %861 = vst [vmem:[%s1760_s7 + $0xb0] sm:$0xff] %v713_v49 }
 0x15d   : > { %869 = vst [vmem:[%s1760_s7 + $0xf0] sm:$0xff] %v737_v50 }
 0x160   : > { %v490_v51 = vpop.f32.mrf.mxu0 }
 0x161   : > { %v766_v52 = vmul.f32 0.088388346, %v490_v51  ;;  %v603_v53 = vpop.f32.mrf.mxu1 }
 0x162   : > { %830 = vst [vmem:[%s1753_s26 + $0xb8] sm:$0xff] %v603_v53  ;;  %s1313_s26 = scalar_lea.hbm %s1312_s11, 256 }
 0x163   : > { %798 = vst [vmem:[%s1756_s6 + $0xb8] sm:$0xff] %v766_v52  ;;  %v716_v54 = vpop.f32.mrf.mxu2  ;;  %v740_v55 = vpop.f32.mrf.mxu3  ;;  %p1314_p12 = scmp.ne.s32.totalorder %s1312_s11, %s1313_s26  ;;  %p1319_p2 = scmp.lt.s32.totalorder %s1317_s13, %s1313_s26 }
 0x164   : > { %862 = vst [vmem:[%s1760_s7 + $0xb8] sm:$0xff] %v716_v54 }
 0x165   : > { %870 = vst [vmem:[%s1760_s7 + $0xf8] sm:$0xff] %v740_v55  ;;  %p1315_p13 = pnand %p1314_p12, %p1506_p4  ;;  %p1320_p3 = por %p1319_p2, %p1318_p1 }
 0x167   : > { %p1316_p0 = pneg %p1315_p13 }
 0x169   : > { %p1321_p5 = pnand %p1320_p3, %p1316_p0 }
 0x16b   : > { %1324 = shalt.err (!%p1321_p5)
}
 0x16c   : > { %s1437_s7 = smov 128   ;;  %s1438_s5 = smov 8  }
 0x16d   : > { %1231 = dma.vmem_to_hbm [thread:$0]  (%p1506_p4), %s1910_s30, 4096, %s918_s22, %s877_s29, %s1437_s7, %s1437_s7, %s1438_s5  }
 0x16e   : > { %s872_s11 = scalar_lea.sflag [#allocation3], %s221_s14  ;;  %s1339_s26 = sshra.s32 %s899_s10, 4  ;;  %s1340_s26 = int_to_ptr.hbm [resolvable:$true] %s1339_s26 }
 0x16f   : > { %s1341_s6 = scalar_lea.hbm %s1340_s26, 256  ;;  %s1345_s21 = scalar_lea.hbm %s2014_s2, 512 }
 0x170   : > { %p1342_p6 = scmp.ne.s32.totalorder %s1340_s26, %s1341_s6  ;;  %p1346_p10 = scmp.lt.s32.totalorder %s1340_s26, %s2014_s2 }
 0x171   : > { %p1347_p11 = scmp.lt.s32.totalorder %s1345_s21, %s1341_s6 }
 0x172   : > { %p1343_p7 = pnand %p1342_p6, %p1506_p4 }
 0x173   : > { %p1348_p12 = por %p1347_p11, %p1346_p10 }
 0x174   : > { %p1344_p9 = pneg %p1343_p7 }
 0x176   : > { %p1349_p13 = pnand %p1348_p12, %p1344_p9 }
 0x178   : > { %1352 = shalt.err (!%p1349_p13)
}
 0x179   : > { %s2025_s22 = sld [smem:[#allocation9_spill]]  ;;  %s1373_s12 = scalar_lea.hbm %s2016_s4, 512 }
 0x17a   : > { %1230 = dma.vmem_to_hbm [thread:$0]  (%p1506_p4), %s1924_s9, 4096, %s899_s10, %s872_s11, %s1437_s7, %s1437_s7, %s1438_s5  }
 0x17f   : > { %s2026_s14 = int_to_ptr.hbm [resolvable:$true] %s2025_s22 }
 0x180   : > { %s1367_s30 = sshra.s32 %s2026_s14, 4  ;;  %s1368_s30 = int_to_ptr.hbm [resolvable:$true] %s1367_s30 }
 0x181   : > { %s1369_s0 = scalar_lea.hbm %s1368_s30, 256  ;;  %p1374_p3 = scmp.lt.s32.totalorder %s1368_s30, %s2016_s4 }
 0x182   : > { %p1370_p0 = scmp.ne.s32.totalorder %s1368_s30, %s1369_s0  ;;  %p1375_p5 = scmp.lt.s32.totalorder %s1373_s12, %s1369_s0 }
 0x184   : > { %p1371_p1 = pnand %p1370_p0, %p1506_p4  ;;  %p1376_p6 = por %p1375_p5, %p1374_p3 }
 0x186   : > { %p1372_p2 = pneg %p1371_p1 }
 0x188   : > { %p1377_p7 = pnand %p1376_p6, %p1372_p2 }
 0x18a   : > { %1380 = shalt.err (!%p1377_p7)
}
 0x18b   : > { %s2027_s9 = smov %s2026_s14 }
 0x18c   : > { %1232 = dma.vmem_to_hbm [thread:$0]  (%p1506_p4), %s1929_s18, 4096, %s2027_s9, %s877_s29, %s1437_s7, %s1437_s7, %s1438_s5  }
 0x18d PF: > { %p1246_p9 = scmp.ge.s32.totalorder %s1435_s20, 2  ;;  %s951_s10 = sand.u32 1, %s1415_s15  }
 0x18e   : > { %s952_s11 = scalar_lea.sflag [#allocation3], %s951_s10 }
 0x18f   : > { %p1237_p10 = pnand %p1246_p9, %p1515_p8 }
 0x191   : > { %p1238_p11 = pneg %p1237_p10 }
 0x193   : > { %1406 = dma.done.wait (%p1238_p11), %s952_s11, 4096  }
 0x194   : > { %1408 = vsyncadd (%p1238_p11), %s952_s11, 4294963200  ;;  %s2028_s25 = sadd.s32 4294967294, %s1435_s20  }
 0x195   : > { %s961_s24 = sand.u32 1, %s2028_s25  }
 0x196   : > { %s962_s8 = scalar_lea.sflag [#allocation5], %s961_s24 }
 0x197   : > { %1410 = dma.done.wait (%p1238_p11), %s962_s8, 8192  }
 0x198   : > { %1412 = vsyncadd (%p1238_p11), %s962_s8, 4294959104  ;;  %s21_s20 = sadd.s32 1, %s1435_s20   ;;  %s2029_s15 = smov %s1419_s16 }
 0x199   : > { %p18_p4 = scmp.ge.s32.totalorder %s21_s20, 4   ;;  %s2030_s16 = smov %s1423_s17 }
 0x19a   : > { %s2031_s17 = smov %s1521_s28  ;;  %s2032_s18 = smov %s1431_s19 }
 0x19b   : > { %s2033_s19 = smov %s2035_s23  ;;  %20 = sbr.rel (!%p18_p4) target bundleno = 8 (0x8), region = 95 }
 0x1a0   :  { %978 = vsyncpa [#allocation3], 1 }
 0x1a1   :  { %980 = vsyncpa [#allocation3 + $0x1], 1 }
 0x1a2   :  { %981 = vsyncpa [#allocation5], 1 }
 0x1a3   :  { %983 = vsyncpa [#allocation5 + $0x1], 1 }

</bundles_post_ra>
